<compile_context>
chip_gen: v7x
topology: tpu7x:2x2x1
jax: 0.10.0
libtpu: 0.0.40
codegen_flags: <defaults>
</compile_context>

<pallas_src>
import functools

import jax
import jax.numpy as jnp
from jax.experimental import pallas as pl
from jax.experimental.pallas import tpu as pltpu

_SOBEL_X = ((-1.0, 0.0, 1.0),
            (-2.0, 0.0, 2.0),
            (-1.0, 0.0, 1.0))
_SOBEL_NORM = 8.0  # sum of |kx| (== sum of |ky|)


def _grad_loss_kernel(x_ref, y_ref, out_ref, *, W, L, N, nimg):
    """One chunk of images flattened to (nimg, L = H*W), lane-dense.

    Writes per-image sums of |8*gx(d)| + |8*gy(d)| with d = x - y; replicate
    ('edge') padding is realized with pltpu.roll + edge-clamp selects along the
    flattened H*W (lane) axis.  out_ref: (nimg, 1) per-image partial sums.
    """
    d = x_ref[...].astype(jnp.float32) - y_ref[...].astype(jnp.float32)

    # Zero image rows beyond N in the (only) partial chunk so they contribute
    # nothing.  Emitted only when needed; replaces the wrapper-side jnp.pad.
    if N % nimg != 0:
        row = jax.lax.broadcasted_iota(jnp.int32, (d.shape[0], 1), 0)
        valid = (pl.program_id(0) * nimg + row) < N
        d = jnp.where(valid, d, 0.0)

    # Edge masks built once at (1, L); the selects below broadcast them.
    lane = jax.lax.broadcasted_iota(jnp.int32, (1, L), 1)
    col = lane % W                       # lowers to an AND for power-of-two W
    first_col = col == 0
    last_col = col == (W - 1)
    first_row = lane < W
    last_row = lane >= (L - W)

    # Row (i) shifts: +-W along the flattened axis via XLU rotate.  The wrapped
    # region is exactly the first/last image row, which the clamp replicates.
    d_ip1 = jnp.where(last_row, d, pltpu.roll(d, shift=L - W, axis=1))   # d[i+1, j]
    d_im1 = jnp.where(first_row, d, pltpu.roll(d, shift=W, axis=1))      # d[i-1, j]

    # Separable, unnormalized Sobel:  kx = [1,2,1]^T (rows) (x) [-1,0,1] (cols).
    sm = d_ip1 + d_im1 + d + d      # [1,2,1] smoothing along rows
    df = d_ip1 - d_im1              # [-1,0,1] derivative along rows

    # Column (j) shifts: +-1, replicate-clamped per W-wide row segment.
    def nb_p1(a):   # value at column j+1
        return jnp.where(last_col, a, pltpu.roll(a, shift=L - 1, axis=1))

    def nb_m1(a):   # value at column j-1
        return jnp.where(first_col, a, pltpu.roll(a, shift=1, axis=1))

    gx8 = nb_p1(sm) - nb_m1(sm)                # 8 * (grad_x of d)
    gy8 = nb_p1(df) + nb_m1(df) + df + df      # 8 * (grad_y of d)

    contrib = jnp.abs(gx8) + jnp.abs(gy8)                    # (nimg, L)
    out_ref[...] = jnp.sum(contrib, axis=1, keepdims=True)   # (nimg, 1)


def _round_down(a, b):
    return (a // b) * b


def _round_up(a, b):
    return (a + b - 1) // b * b


def grad_loss(x, y, *, target_block_bytes=1 << 20):
    """Pallas implementation of GradLoss.forward(x, y).  x, y: (B, C, H, W)."""
    assert x.shape == y.shape and x.ndim == 4
    B, C, H, W = x.shape
    N = B * C
    L = H * W

    # Copy-free, lane-dense layout: (B, C, H, W) -> (B*C, H*W).
    xr = x.reshape(N, L)
    yr = y.reshape(N, L)

    # Images per grid step: ~target_block_bytes of f32 per input tile, multiple
    # of 8 (f32 sublane quantum).  Keep >= 2 chunks when N >= 16 so both v7x
    # TensorCores get work on the "parallel" grid axis.
    nimg = max(1, target_block_bytes // (4 * L))
    nimg = max(8, _round_down(nimg, 8))
    if N >= 16:
        nimg = min(nimg, max(8, _round_down(N // 2, 8)))
    nimg = min(nimg, max(8, _round_up(N, 8)))   # never taller than one full cover
    num_chunks = pl.cdiv(N, nimg)

    kernel = functools.partial(_grad_loss_kernel, W=W, L=L, N=N, nimg=nimg)

    partials = pl.pallas_call(
        kernel,
        out_shape=jax.ShapeDtypeStruct((N, 1), jnp.float32),
        grid=(num_chunks,),
        in_specs=[
            pl.BlockSpec((nimg, L), lambda i: (i, 0)),
            pl.BlockSpec((nimg, L), lambda i: (i, 0)),
        ],
        out_specs=pl.BlockSpec((nimg, 1), lambda i: (i, 0)),
        compiler_params=pltpu.CompilerParams(
            dimension_semantics=("parallel",),   # chunks are independent
            vmem_limit_bytes=48 * 1024 * 1024,   # within v7x's 64 MiB physical
        ),
    )(xr, yr)

    # Fold the Sobel normalization (1/8) and the L1 mean (1/count) in once.
    scale = (1.0 / _SOBEL_NORM) / float(N * 2 * H * W)
    return jnp.sum(partials) * scale


def _ref_grad_loss(x, y):
    """Pure-JAX reference matching the PyTorch module."""
    kx = jnp.array(_SOBEL_X, jnp.float32) / _SOBEL_NORM
    ky = kx.T
    B, C, H, W = x.shape

    def grads(a):
        ap = jnp.pad(a, ((0, 0), (0, 0), (1, 1), (1, 1)), mode="edge")
        gx = sum(kx[di, dj] * ap[..., di:di + H, dj:dj + W]
                 for di in range(3) for dj in range(3))
        gy = sum(ky[di, dj] * ap[..., di:di + H, dj:dj + W]
                 for di in range(3) for dj in range(3))
        return jnp.stack([gx, gy], axis=2)  # (B, C, 2, H, W)

    return jnp.mean(jnp.abs(grads(x) - grads(y)))


if __name__ == "__main__":
    B, C, H, W = 2, 4, 16, 16
    key = jax.random.PRNGKey(0)
    kx_, ky_ = jax.random.split(key)
    x = jax.random.normal(kx_, (B, C, H, W), dtype=jnp.float32)
    y = jax.random.normal(ky_, (B, C, H, W), dtype=jnp.float32)

    loss = jax.block_until_ready(grad_loss(x, y))
    ref = jax.block_until_ready(_ref_grad_loss(x, y))

    assert jnp.isfinite(loss), "non-finite loss"
    assert abs(float(loss) - float(ref)) < 1e-5 * (1.0 + abs(float(ref))), (
        float(loss), float(ref))
    print("KERNEL_OK")
</pallas_src>

<mosaic_0001>
module attributes {stable_mosaic.version = 11 : i64} {
  func.func @_grad_loss_kernel(%arg0: i32, %arg1: memref<8x256xf32, #tpu.memory_space<vmem>>, %arg2: memref<8x256xf32, #tpu.memory_space<vmem>>, %arg3: memref<8x1xf32, #tpu.memory_space<vmem>>) attributes {dimension_semantics = [#tpu.dimension_semantics<parallel>], iteration_bounds = array<i64: 1>, scalar_prefetch = 0 : i64, scratch_operands = 0 : i64, tpu.core_type = #tpu.core_type<tc>, window_params = [{transform_indices = @transform_0, window_bounds = array<i64: 8, 256>}, {transform_indices = @transform_1, window_bounds = array<i64: 8, 256>}, {transform_indices = @transform_2, window_bounds = array<i64: 8, 1>}]} {
    %c0 = arith.constant 0 : index
    %c0_0 = arith.constant 0 : index
    %0 = vector.load %arg1[%c0, %c0_0] : memref<8x256xf32, #tpu.memory_space<vmem>>, vector<8x256xf32>
    %c0_1 = arith.constant 0 : index
    %c0_2 = arith.constant 0 : index
    %1 = vector.load %arg2[%c0_1, %c0_2] : memref<8x256xf32, #tpu.memory_space<vmem>>, vector<8x256xf32>
    %2 = arith.subf %0, %1 : vector<8x256xf32>
    %3 = tpu.iota {dimensions = array<i32: 1>} : vector<1x256xi32>
    %c16_i32 = arith.constant 16 : i32
    %c0_i32 = arith.constant 0 : i32
    %4 = arith.cmpi eq, %c16_i32, %c0_i32 : i32
    %c1_i32 = arith.constant 1 : i32
    %5 = arith.select %4, %c1_i32, %c16_i32 : i32
    %6 = vector.broadcast %5 : i32 to vector<1x256xi32>
    %7 = arith.remsi %3, %6 : vector<1x256xi32>
    %c0_i32_3 = arith.constant 0 : i32
    %8 = vector.broadcast %c0_i32_3 : i32 to vector<1x256xi32>
    %9 = arith.cmpi ne, %7, %8 : vector<1x256xi32>
    %c0_i32_4 = arith.constant 0 : i32
    %10 = vector.broadcast %c0_i32_4 : i32 to vector<1x256xi32>
    %11 = arith.cmpi slt, %7, %10 : vector<1x256xi32>
    %c0_i32_5 = arith.constant 0 : i32
    %12 = arith.cmpi slt, %5, %c0_i32_5 : i32
    %13 = vector.broadcast %12 : i1 to vector<1x256xi1>
    %14 = vector.broadcast %13 : vector<1x256xi1> to vector<1x256xi1>
    %15 = arith.xori %11, %14 : vector<1x256xi1>
    %16 = arith.andi %15, %9 : vector<1x256xi1>
    %17 = vector.broadcast %5 : i32 to vector<1x256xi32>
    %18 = arith.addi %7, %17 : vector<1x256xi32>
    %19 = arith.select %16, %18, %7 : vector<1x256xi1>, vector<1x256xi32>
    %c0_i32_6 = arith.constant 0 : i32
    %20 = vector.broadcast %c0_i32_6 : i32 to vector<1x256xi32>
    %21 = arith.cmpi eq, %19, %20 : vector<1x256xi32>
    %c15_i32 = arith.constant 15 : i32
    %22 = vector.broadcast %c15_i32 : i32 to vector<1x256xi32>
    %23 = arith.cmpi eq, %19, %22 : vector<1x256xi32>
    %c16_i32_7 = arith.constant 16 : i32
    %24 = vector.broadcast %c16_i32_7 : i32 to vector<1x256xi32>
    %25 = arith.cmpi slt, %3, %24 : vector<1x256xi32>
    %c240_i32 = arith.constant 240 : i32
    %26 = vector.broadcast %c240_i32 : i32 to vector<1x256xi32>
    %27 = arith.cmpi sge, %3, %26 : vector<1x256xi32>
    %c240_i32_8 = arith.constant 240 : i32
    %28 = tpu.dynamic_rotate %2 by %c240_i32_8 dim 1 : vector<8x256xf32>, i32 -> vector<8x256xf32>
    %29 = vector.shape_cast %27 : vector<1x256xi1> to vector<1x256xi1>
    %30 = vector.broadcast %29 : vector<1x256xi1> to vector<8x256xi1>
    %31 = arith.select %30, %2, %28 : vector<8x256xi1>, vector<8x256xf32>
    %c16_i32_9 = arith.constant 16 : i32
    %32 = tpu.dynamic_rotate %2 by %c16_i32_9 dim 1 : vector<8x256xf32>, i32 -> vector<8x256xf32>
    %33 = vector.shape_cast %25 : vector<1x256xi1> to vector<1x256xi1>
    %34 = vector.broadcast %33 : vector<1x256xi1> to vector<8x256xi1>
    %35 = arith.select %34, %2, %32 : vector<8x256xi1>, vector<8x256xf32>
    %36 = arith.addf %31, %35 : vector<8x256xf32>
    %37 = arith.addf %36, %2 : vector<8x256xf32>
    %38 = arith.addf %37, %2 : vector<8x256xf32>
    %39 = arith.subf %31, %35 : vector<8x256xf32>
    %c255_i32 = arith.constant 255 : i32
    %40 = tpu.dynamic_rotate %38 by %c255_i32 dim 1 : vector<8x256xf32>, i32 -> vector<8x256xf32>
    %41 = vector.shape_cast %23 : vector<1x256xi1> to vector<1x256xi1>
    %42 = vector.broadcast %41 : vector<1x256xi1> to vector<8x256xi1>
    %43 = arith.select %42, %38, %40 : vector<8x256xi1>, vector<8x256xf32>
    %c1_i32_10 = arith.constant 1 : i32
    %44 = tpu.dynamic_rotate %38 by %c1_i32_10 dim 1 : vector<8x256xf32>, i32 -> vector<8x256xf32>
    %45 = vector.shape_cast %21 : vector<1x256xi1> to vector<1x256xi1>
    %46 = vector.broadcast %45 : vector<1x256xi1> to vector<8x256xi1>
    %47 = arith.select %46, %38, %44 : vector<8x256xi1>, vector<8x256xf32>
    %48 = arith.subf %43, %47 : vector<8x256xf32>
    %c255_i32_11 = arith.constant 255 : i32
    %49 = tpu.dynamic_rotate %39 by %c255_i32_11 dim 1 : vector<8x256xf32>, i32 -> vector<8x256xf32>
    %50 = vector.shape_cast %23 : vector<1x256xi1> to vector<1x256xi1>
    %51 = vector.broadcast %50 : vector<1x256xi1> to vector<8x256xi1>
    %52 = arith.select %51, %39, %49 : vector<8x256xi1>, vector<8x256xf32>
    %c1_i32_12 = arith.constant 1 : i32
    %53 = tpu.dynamic_rotate %39 by %c1_i32_12 dim 1 : vector<8x256xf32>, i32 -> vector<8x256xf32>
    %54 = vector.shape_cast %21 : vector<1x256xi1> to vector<1x256xi1>
    %55 = vector.broadcast %54 : vector<1x256xi1> to vector<8x256xi1>
    %56 = arith.select %55, %39, %53 : vector<8x256xi1>, vector<8x256xf32>
    %57 = arith.addf %52, %56 : vector<8x256xf32>
    %58 = arith.addf %57, %39 : vector<8x256xf32>
    %59 = arith.addf %58, %39 : vector<8x256xf32>
    %60 = math.absf %48 : vector<8x256xf32>
    %61 = math.absf %59 : vector<8x256xf32>
    %62 = arith.addf %60, %61 : vector<8x256xf32>
    %cst = arith.constant dense<0.000000e+00> : vector<8xf32>
    %63 = vector.multi_reduction <add>, %62, %cst [1] : vector<8x256xf32> to vector<8xf32>
    %64 = vector.shape_cast %63 : vector<8xf32> to vector<8x1xf32>
    %c0_13 = arith.constant 0 : index
    %c0_14 = arith.constant 0 : index
    %65 = vector.load %arg3[%c0_13, %c0_14] : memref<8x1xf32, #tpu.memory_space<vmem>>, vector<8x1xf32>
    tpu.vector_store %arg3[%c0_13, %c0_14], %64 {strides = array<i32>} : memref<8x1xf32, #tpu.memory_space<vmem>>, vector<8x1xf32>,
    return
  }
  func.func @transform_0(%arg0: i32) -> (i32, i32) {
    %c0_i32 = arith.constant 0 : i32
    %c0_i32_0 = arith.constant 0 : i32
    return %arg0, %c0_i32 : i32, i32
  }
  func.func @transform_1(%arg0: i32) -> (i32, i32) {
    %c0_i32 = arith.constant 0 : i32
    %c0_i32_0 = arith.constant 0 : i32
    return %arg0, %c0_i32 : i32, i32
  }
  func.func @transform_2(%arg0: i32) -> (i32, i32) {
    %c0_i32 = arith.constant 0 : i32
    %c0_i32_0 = arith.constant 0 : i32
    return %arg0, %c0_i32 : i32, i32
  }
}

</mosaic_0001>

<bundles_post_ra>
// kernel: tpu_custom_call.1
= control target key start
LH: loop header
LB: loop body
LE: loop exit
PB: predicated region body
PF: predicated region fallthrough
CT: control target
= control target key end

     0   :  { %7 = vsyncpa [#allocation3], 0  ;;  %s334_s0 = inlined_call_operand.hbm [shape: f32[8,256], index: 0, kind: input, shape index: {}]   ;;  %s335_s1 = inlined_call_operand.hbm [shape: f32[8,256], index: 1, kind: input, shape index: {}]   ;;  %s336_s2 = inlined_call_operand.vmem [shape: f32[8,1], index: 2, kind: output, shape index: {}]  }
   0x1   :  { %8 = vsyncpa [#allocation5], 0  ;;  %s230_s9 = smov [#allocation2]   ;;  %s231_s11 = smov [#allocation4]  }
   0x2   :  { %s15_s10 = sshll.u32 %s230_s9, 4  ;;  %s25_s12 = sshll.u32 %s231_s11, 4  ;;  %s16_s10 = int_to_ptr.vmem [resolvable:$true] %s15_s10  ;;  %s26_s12 = int_to_ptr.vmem [resolvable:$true] %s25_s12 }
   0x3   :  { %s182_s15 = scalar_lea.hbm %s334_s0, 256 }
   0x4   :  { %p183_p0 = scmp.ne.s32.totalorder %s334_s0, %s182_s15  ;;  %p186_p1 = scmp.lt.u32.totalorder %s182_s15, %s334_s0 }
   0x6   :  { %p188_p2 = pnand %p186_p1, %p183_p0 }
   0x8   :  { %191 = shalt.err (!%p188_p2)
}
   0x9   :  { %s192_s20 = scalar_lea.vmem %s16_s10, 256  ;;  %p197_p4 = scmp.lt.s32.totalorder %s16_s10, %s16_s10 }
   0xa   :  { %p193_p3 = scmp.ne.s32.totalorder %s16_s10, %s192_s20  ;;  %p198_p5 = scmp.lt.s32.totalorder %s192_s20, %s192_s20 }
   0xc   :  { %p199_p6 = por %p198_p5, %p197_p4 }
   0xe   :  { %p200_p7 = pnand %p199_p6, %p193_p3 }
  0x10   :  { %203 = shalt.err (!%p200_p7)
}
  0x11   :  { %18 = dma.hbm_to_vmem [thread:$0]  %s334_s0, 256, %s16_s10, [#allocation3]  }
  0x12   :  { %s204_s25 = scalar_lea.hbm %s335_s1, 256 }
  0x13   :  { %p205_p8 = scmp.ne.s32.totalorder %s335_s1, %s204_s25  ;;  %p208_p9 = scmp.lt.u32.totalorder %s204_s25, %s335_s1 }
  0x15   :  { %p210_p10 = pnand %p208_p9, %p205_p8 }
  0x17   :  { %213 = shalt.err (!%p210_p10)
}
  0x18   :  { %s214_s30 = scalar_lea.vmem %s26_s12, 256  ;;  %p219_p12 = scmp.lt.s32.totalorder %s26_s12, %s26_s12 }
  0x19   :  { %p215_p11 = scmp.ne.s32.totalorder %s26_s12, %s214_s30  ;;  %p220_p13 = scmp.lt.s32.totalorder %s214_s30, %s214_s30 }
  0x1b   :  { %p221_p0 = por %p220_p13, %p219_p12 }
  0x1d   :  { %p222_p1 = pnand %p221_p0, %p215_p11 }
  0x1f   :  { %225 = shalt.err (!%p222_p1)
}
  0x20   :  { %28 = dma.hbm_to_vmem [thread:$0]  %s335_s1, 256, %s26_s12, [#allocation5]  }
  0x21   :  { %226 = dma.done.wait [#allocation3], 256  }
  0x22   :  { %227 = vsyncadd [#allocation3], 4294967040 }
  0x23   :  { %228 = dma.done.wait [#allocation5], 256  }
  0x24   :  { %229 = vsyncadd [#allocation5], 4294967040  ;;  %v35_v0 = vld [vmem:[#allocation2] sm:$0xff]  ;;  %v37_v1 = vld [vmem:[#allocation4] sm:$0xff]  ;;  %s232_s4 = smov 16   ;;  %s233_s5 = smov 112   ;;  %v41_v6 = vlaneseq }
  0x25   :  { %v36_v2 = vld [vmem:[#allocation2 + $0x8] sm:$0xff]  ;;  %v39_v3 = vsub.f32 %v35_v0, %v37_v1  ;;  %v38_v4 = vld [vmem:[#allocation4 + $0x8] sm:$0xff]  ;;  %s234_s1 = smov 127   ;;  %s235_s6 = smov 1   ;;  %vm168_vm9 = vcmask 7168  }
  0x26   :  { %v40_v5 = vsub.f32 %v36_v2, %v38_v4  ;;  %v275_v7 = vand.u32 127, %v41_v6 }
  0x27   :  { %89 = vrot.lane.b32.xlu1 %v39_v3, %s232_s4  ;;  %76 = vrot.lane.b32.xlu0 %v39_v3, %s233_s5 }
  0x28   :  { %v43_v8 = vadd.s32 128, %v275_v7  ;;  %vm72_vm0 = vcmp.lt.s32.totalorder %v275_v7, 16  ;;  %vm80_vm1 = vcmp.lt.s32.totalorder %v275_v7, 112  ;;  %v48_v27 = vand.u32 15, %v275_v7 }
  0x29   :  { %vm113_vm3 = vcmp.lt.s32.totalorder %v275_v7, 127  ;;  %vm126_vm6 = vcmp.lt.s32.totalorder %v275_v7, 1 }
  0x2a   :  { %vm75_vm2 = vcmp.ge.s32.totalorder %v43_v8, 240  ;;  %v55_v28 = vand.u32 15, %v43_v8  ;;  %vm282_vm4 = vcmp.eq.s32.totalorder %v48_v27, 15  ;;  %vm295_vm7 = vcmp.eq.s32.totalorder %v48_v27, 0 }
  0x2b   :  { %91 = vrot.lane.b32.xlu1 %v40_v5, %s232_s4  ;;  %78 = vrot.lane.b32.xlu0 %v40_v5, %s233_s5 }
  0x2c   :  { %vm286_vm5 = vcmp.eq.s32.totalorder %v55_v28, 15  ;;  %vm299_vm8 = vcmp.eq.s32.totalorder %v55_v28, 0 }
  0x99   :  { %v90_v9 = vpop.permute.xlu1 %89  ;;  %v77_v10 = vpop.permute.xlu0 %76 }
  0x9d   :  { %v92_v11 = vpop.permute.xlu1 %91  ;;  %v79_v12 = vpop.permute.xlu0 %78 }
  0x9e   :  { %v93_v13 = vsel %vm72_vm0, %v90_v9, %v92_v11  ;;  %v94_v14 = vsel %vm72_vm0, %v92_v11, %v90_v9  ;;  %v81_v15 = vsel %vm80_vm1, %v77_v10, %v79_v12  ;;  %v82_v16 = vsel %vm80_vm1, %v79_v12, %v77_v10 }
  0x9f   :  { %v99_v17 = vsel %vm72_vm0, %v39_v3, %v94_v14  ;;  %v88_v18 = vsel %vm75_vm2, %v40_v5, %v82_v16 }
  0xa0   :  { %v101_v19 = vadd.f32 %v99_v17, %v81_v15  ;;  %v102_v20 = vadd.f32 %v93_v13, %v88_v18  ;;  %v107_v21 = vsub.f32 %v81_v15, %v99_v17  ;;  %v108_v22 = vsub.f32 %v88_v18, %v93_v13 }
  0xa2   :  { %139 = vrot.lane.b32.xlu1 %v108_v22, %s234_s1  ;;  %137 = vrot.lane.b32.xlu0 %v107_v21, %s234_s1  ;;  %v103_v23 = vadd.f32 %v101_v19, %v39_v3  ;;  %v104_v24 = vadd.f32 %v102_v20, %v40_v5 }
  0xa4   :  { %v105_v25 = vadd.f32 %v103_v23, %v39_v3  ;;  %v106_v26 = vadd.f32 %v104_v24, %v40_v5 }
  0xa6   :  { %147 = vrot.lane.b32.xlu1 %v108_v22, %s235_s6  ;;  %145 = vrot.lane.b32.xlu0 %v107_v21, %s235_s6 }
  0xaa   :  { %111 = vrot.lane.b32.xlu1 %v106_v26, %s234_s1  ;;  %109 = vrot.lane.b32.xlu0 %v105_v25, %s234_s1 }
  0xae   :  { %124 = vrot.lane.b32.xlu1 %v106_v26, %s235_s6  ;;  %122 = vrot.lane.b32.xlu0 %v105_v25, %s235_s6 }
 0x114   :  { %v140_v29 = vpop.permute.xlu1 %139  ;;  %v138_v30 = vpop.permute.xlu0 %137 }
 0x115   :  { %v141_v33 = vsel %vm113_vm3, %v138_v30, %v140_v29  ;;  %v142_v34 = vsel %vm113_vm3, %v140_v29, %v138_v30 }
 0x116   :  { %v143_v41 = vsel %vm282_vm4, %v107_v21, %v141_v33  ;;  %v144_v42 = vsel %vm286_vm5, %v108_v22, %v142_v34 }
 0x118   :  { %v148_v37 = vpop.permute.xlu1 %147  ;;  %v146_v38 = vpop.permute.xlu0 %145 }
 0x119   :  { %v149_v39 = vsel %vm126_vm6, %v146_v38, %v148_v37  ;;  %v150_v40 = vsel %vm126_vm6, %v148_v37, %v146_v38 }
 0x11a   :  { %v151_v43 = vsel %vm295_vm7, %v107_v21, %v150_v40  ;;  %v152_v44 = vsel %vm299_vm8, %v108_v22, %v149_v39 }
 0x11b   :  { %v153_v45 = vadd.f32 %v151_v43, %v143_v41  ;;  %v154_v46 = vadd.f32 %v152_v44, %v144_v42 }
 0x11c   :  { %v112_v47 = vpop.permute.xlu1 %111  ;;  %v110_v48 = vpop.permute.xlu0 %109 }
 0x11d   :  { %v155_v49 = vadd.f32 %v153_v45, %v107_v21  ;;  %v156_v50 = vadd.f32 %v154_v46, %v108_v22  ;;  %v114_v51 = vsel %vm113_vm3, %v110_v48, %v112_v47  ;;  %v115_v52 = vsel %vm113_vm3, %v112_v47, %v110_v48 }
 0x11e   :  { %v120_v59 = vsel %vm282_vm4, %v105_v25, %v114_v51  ;;  %v121_v60 = vsel %vm286_vm5, %v106_v26, %v115_v52 }
 0x11f   :  { %v157_v55 = vadd.f32 %v155_v49, %v107_v21  ;;  %v158_v58 = vadd.f32 %v156_v50, %v108_v22 }
 0x120   :  { %v125_v53 = vpop.permute.xlu1 %124  ;;  %v123_v54 = vpop.permute.xlu0 %122 }
 0x121   :  { %v127_v56 = vsel %vm126_vm6, %v123_v54, %v125_v53  ;;  %v128_v57 = vsel %vm126_vm6, %v125_v53, %v123_v54  ;;  %v161_v1 = vand.u32 2147483647, %v157_v55  ;;  %v162_v4 = vand.u32 2147483647, %v158_v58 }
 0x122   :  { %v133_v61 = vsel %vm295_vm7, %v105_v25, %v128_v57  ;;  %v134_v62 = vsel %vm299_vm8, %v106_v26, %v127_v56 }
 0x123   :  { %v135_v63 = vsub.f32 %v120_v59, %v133_v61  ;;  %v136_v0 = vsub.f32 %v121_v60, %v134_v62 }
 0x125   :  { %v159_v2 = vand.u32 2147483647, %v135_v63  ;;  %v160_v3 = vand.u32 2147483647, %v136_v0 }
 0x127   :  { %v163_v5 = vadd.f32 %v161_v1, %v159_v2  ;;  %v164_v6 = vadd.f32 %v162_v4, %v160_v3 }
 0x129   :  { %v165_v7 = vadd.f32 %v164_v6, %v163_v5 }
 0x12b   :  { %166 = vadd.xlane.f32.xlu0 %v165_v7 }
 0x1b8   :  { %v167_v8 = vpop.xlane.xlu0 %166 }
 0x1b9   :  { %169 = vst.msk [vmem:[%s336_s2] sm:$0xff] %vm168_vm9, %v167_v8 }
 0x1ba   :  { %174 = vsyncpa [#allocation3], 1 }
 0x1bb   :  { %175 = vsyncpa [#allocation5], 1 }

</bundles_post_ra>
